<compile_context>
chip_gen: v5e
topology: v5e:2x2
jax: 0.10.0
libtpu: 0.0.40
codegen_flags: <defaults>
</compile_context>

<pallas_src>
import jax
import jax.numpy as jnp
import numpy as np
from jax.experimental import pallas as pl
from jax.experimental.pallas import tpu as pltpu


def bahdanau_kernel(enc_ref, h_ref, w1_ref, b1_ref, w2_ref, b2_ref,
                    wa_ref, ba_ref, attn_ref, ctx_ref):
    # Block shapes:
    #   enc_ref : (TB, L, F)   h_ref : (TB, H)
    #   w1_ref  : (H, A)       b1_ref: (1, A)
    #   w2_ref  : (F, A)       b2_ref: (1, A)
    #   wa_ref  : (1, A)       ba_ref: (1,)   [SMEM scalar]
    #   attn_ref: (TB, L)      ctx_ref: (TB, F)
    enc = enc_ref[...]                                   # (TB, L, F)
    h = h_ref[...]                                       # (TB, H)
    tb, L, F = enc.shape
    A = w2_ref.shape[-1]

    # fc1(decoder_hidden): (TB, H) @ (H, A) -> (TB, A)
    x_dec = jnp.dot(h, w1_ref[...],
                    preferred_element_type=jnp.float32) + b1_ref[...]

    # fc2(encoder_output): fold batch*seq into the MXU M dimension.
    x_enc = jnp.dot(enc.reshape(tb * L, F), w2_ref[...],
                    preferred_element_type=jnp.float32) + b2_ref[...]
    x_enc = x_enc.reshape(tb, L, A)

    # tanh(x_encoder + x_decoder.unsqueeze(1))            (TB, L, A)
    combined = jnp.tanh(x_enc + x_dec[:, None, :])

    # attention_score head: reduce over A -> (TB, L) (lane-dense in L).
    scores = jnp.sum(combined * wa_ref[...], axis=-1) + ba_ref[0]

    # softmax over the sequence axis (last axis of the (TB, L) tile).
    m = jnp.max(scores, axis=-1, keepdims=True)           # (TB, 1)
    e = jnp.exp(scores - m)                                # (TB, L)
    denom = jnp.sum(e, axis=-1, keepdims=True)             # (TB, 1)
    soft = e * pl.reciprocal(denom, approx=True)           # (TB, L)

    attn_ref[...] = soft.astype(attn_ref.dtype)

    # context = sum_L soft * enc, done on the MXU:
    #   (TB, 1, L) @ (TB, L, F) -> (TB, 1, F)
    ctx = jnp.einsum('bql,blf->bqf',
                     soft[:, None, :].astype(enc.dtype), enc,
                     preferred_element_type=jnp.float32)
    ctx_ref[...] = ctx[:, 0, :].astype(ctx_ref.dtype)


def bahdanau_attention(encoder_output, decoder_hidden, params, *,
                       batch_block=8, compute_dtype=None):
    """Returns (soft_maxed_attention (B,L), attention_weights (B,F))."""
    B, L, F = encoder_output.shape
    H = decoder_hidden.shape[-1]
    A = params["w1"].shape[-1]

    # Keep the batch block a multiple of 8 so the sublane dim of the
    # (TB, H)/(TB, L)/(TB, F) blocks is tileable.
    tb = max(8, (batch_block // 8) * 8)
    Bp = ((B + tb - 1) // tb) * tb
    if Bp != B:
        encoder_output = jnp.pad(encoder_output,
                                 ((0, Bp - B), (0, 0), (0, 0)))
        decoder_hidden = jnp.pad(decoder_hidden, ((0, Bp - B), (0, 0)))

    w1 = params["w1"].astype(jnp.float32)                 # (H, A)
    b1 = params["b1"].reshape(1, A).astype(jnp.float32)
    w2 = params["w2"]                                      # (F, A)
    b2 = params["b2"].reshape(1, A).astype(jnp.float32)
    wa = params["wa"].reshape(1, A).astype(jnp.float32)
    ba = params["ba"].reshape(1).astype(jnp.float32)       # SMEM scalar

    if compute_dtype is not None:
        # Optional bf16 streaming of the encoder (dominant HBM traffic) and w2
        # on v6e/v7x; accumulation stays f32 inside the kernel.
        encoder_output = encoder_output.astype(compute_dtype)
        w2 = w2.astype(compute_dtype)
    else:
        w2 = w2.astype(jnp.float32)

    # TODO(synk): for production L*F that no longer fits VMEM, add an
    # 'arbitrary' L grid axis with an online-softmax accumulator (running
    # max/sum + ctx scratch, init/finalize via pl.when) and raise
    # vmem_limit_bytes for large TB blocks.
    grid = (Bp // tb,)

    attn, ctx = pl.pallas_call(
        bahdanau_kernel,
        out_shape=(
            jax.ShapeDtypeStruct((Bp, L), jnp.float32),
            jax.ShapeDtypeStruct((Bp, F), jnp.float32),
        ),
        grid_spec=pltpu.PrefetchScalarGridSpec(
            num_scalar_prefetch=0,
            grid=grid,
            in_specs=[
                pl.BlockSpec((tb, L, F), lambda b: (b, 0, 0)),   # encoder
                pl.BlockSpec((tb, H), lambda b: (b, 0)),          # decoder h
                pl.BlockSpec((H, A), lambda b: (0, 0)),           # w1
                pl.BlockSpec((1, A), lambda b: (0, 0)),           # b1
                pl.BlockSpec((F, A), lambda b: (0, 0)),           # w2
                pl.BlockSpec((1, A), lambda b: (0, 0)),           # b2
                pl.BlockSpec((1, A), lambda b: (0, 0)),           # wa
                pl.BlockSpec(memory_space=pltpu.MemorySpace.SMEM),  # ba
            ],
            out_specs=[
                pl.BlockSpec((tb, L), lambda b: (b, 0)),          # softmax
                pl.BlockSpec((tb, F), lambda b: (b, 0)),          # context
            ],
        ),
        compiler_params=pltpu.CompilerParams(
            dimension_semantics=("parallel",),
        ),
    )(encoder_output, decoder_hidden, w1, b1, w2, b2, wa, ba)

    return attn[:B], ctx[:B]


def bahdanau_reference(enc, h, params):
    x_dec = h @ params["w1"] + params["b1"]                   # (B, A)
    x_enc = enc @ params["w2"] + params["b2"]                 # (B, L, A)
    combined = jnp.tanh(x_enc + x_dec[:, None, :])            # (B, L, A)
    scores = (combined @ params["wa"].reshape(-1, 1))[..., 0] + params["ba"]
    soft = jax.nn.softmax(scores, axis=1)                     # (B, L)
    ctx = jnp.sum(enc * soft[..., None], axis=1)              # (B, F)
    return soft, ctx


if __name__ == "__main__":
    # Small shapes consistent with the module's forward:
    #   encoder_output: (B, L, num_features), decoder_hidden: (B, hidden_dim)
    B, L, F, H, A = 2, 8, 4, 32, 16

    key = jax.random.PRNGKey(0)
    k_enc, k_h, k_w1, k_b1, k_w2, k_b2, k_wa, k_ba = jax.random.split(key, 8)

    encoder_output = jax.random.normal(k_enc, (B, L, F), dtype=jnp.float32)
    decoder_hidden = jax.random.normal(k_h, (B, H), dtype=jnp.float32)

    # Deterministic parameter init (shapes from nn.Linear; stored as (in, out)).
    params = {
        "w1": 0.1 * jax.random.normal(k_w1, (H, A), dtype=jnp.float32),
        "b1": 0.1 * jax.random.normal(k_b1, (A,), dtype=jnp.float32),
        "w2": 0.1 * jax.random.normal(k_w2, (F, A), dtype=jnp.float32),
        "b2": 0.1 * jax.random.normal(k_b2, (A,), dtype=jnp.float32),
        "wa": 0.1 * jax.random.normal(k_wa, (A,), dtype=jnp.float32),
        "ba": 0.1 * jax.random.normal(k_ba, (1,), dtype=jnp.float32),
    }

    soft, ctx = bahdanau_attention(encoder_output, decoder_hidden, params)
    jax.block_until_ready((soft, ctx))

    soft_ref, ctx_ref = bahdanau_reference(encoder_output, decoder_hidden, params)
    # Tolerance loosened slightly for pl.reciprocal(approx=True) (~1e-4 rel).
    np.testing.assert_allclose(np.asarray(soft), np.asarray(soft_ref),
                               rtol=1e-3, atol=1e-3)
    np.testing.assert_allclose(np.asarray(ctx), np.asarray(ctx_ref),
                               rtol=1e-3, atol=1e-3)

    print("KERNEL_OK")
</pallas_src>

<mosaic_0001>
module attributes {stable_mosaic.version = 11 : i64} {
  func.func @bahdanau_kernel(%arg0: i32, %arg1: memref<8x8x4xf32, #tpu.memory_space<vmem>>, %arg2: memref<8x32xf32, #tpu.memory_space<vmem>>, %arg3: memref<32x16xf32, #tpu.memory_space<vmem>>, %arg4: memref<1x16xf32, #tpu.memory_space<vmem>>, %arg5: memref<4x16xf32, #tpu.memory_space<vmem>>, %arg6: memref<1x16xf32, #tpu.memory_space<vmem>>, %arg7: memref<1x16xf32, #tpu.memory_space<vmem>>, %arg8: memref<1xf32, #tpu.memory_space<smem>>, %arg9: memref<8x8xf32, #tpu.memory_space<vmem>>, %arg10: memref<8x4xf32, #tpu.memory_space<vmem>>) attributes {dimension_semantics = [#tpu.dimension_semantics<parallel>], iteration_bounds = array<i64: 1>, scalar_prefetch = 0 : i64, scratch_operands = 0 : i64, tpu.core_type = #tpu.core_type<tc>, window_params = [{transform_indices = @transform_0, window_bounds = array<i64: 8, 8, 4>}, {transform_indices = @transform_1, window_bounds = array<i64: 8, 32>}, {pipeline_mode = #tpu.pipeline_mode<synchronous>, transform_indices = @transform_2, window_bounds = array<i64: 32, 16>}, {pipeline_mode = #tpu.pipeline_mode<synchronous>, transform_indices = @transform_3, window_bounds = array<i64: 1, 16>}, {pipeline_mode = #tpu.pipeline_mode<synchronous>, transform_indices = @transform_4, window_bounds = array<i64: 4, 16>}, {pipeline_mode = #tpu.pipeline_mode<synchronous>, transform_indices = @transform_5, window_bounds = array<i64: 1, 16>}, {pipeline_mode = #tpu.pipeline_mode<synchronous>, transform_indices = @transform_6, window_bounds = array<i64: 1, 16>}, {transform_indices = @transform_7, window_bounds = array<i64: 1>}, {transform_indices = @transform_8, window_bounds = array<i64: 8, 8>}, {transform_indices = @transform_9, window_bounds = array<i64: 8, 4>}]} {
    %c0 = arith.constant 0 : index
    %c0_0 = arith.constant 0 : index
    %c0_1 = arith.constant 0 : index
    %0 = vector.load %arg1[%c0, %c0_0, %c0_1] : memref<8x8x4xf32, #tpu.memory_space<vmem>>, vector<8x8x4xf32>
    %c0_2 = arith.constant 0 : index
    %c0_3 = arith.constant 0 : index
    %1 = vector.load %arg2[%c0_2, %c0_3] : memref<8x32xf32, #tpu.memory_space<vmem>>, vector<8x32xf32>
    %c0_4 = arith.constant 0 : index
    %c0_5 = arith.constant 0 : index
    %2 = vector.load %arg3[%c0_4, %c0_5] : memref<32x16xf32, #tpu.memory_space<vmem>>, vector<32x16xf32>
    %cst = arith.constant dense<0.000000e+00> : vector<8x16xf32>
    %3 = tpu.matmul %1, %2, %cst {dimension_numbers = #tpu.dot_dimension_numbers<[1], [0], [0], [1], [0, 0, 1, 1], [], []>} : vector<8x32xf32>, vector<32x16xf32>, vector<8x16xf32> -> vector<8x16xf32>
    %c0_6 = arith.constant 0 : index
    %c0_7 = arith.constant 0 : index
    %4 = vector.load %arg4[%c0_6, %c0_7] : memref<1x16xf32, #tpu.memory_space<vmem>>, vector<1x16xf32>
    %5 = vector.broadcast %4 : vector<1x16xf32> to vector<8x16xf32>
    %6 = arith.addf %3, %5 : vector<8x16xf32>
    %7 = vector.shape_cast %0 : vector<8x8x4xf32> to vector<64x4xf32>
    %c0_8 = arith.constant 0 : index
    %c0_9 = arith.constant 0 : index
    %8 = vector.load %arg5[%c0_8, %c0_9] : memref<4x16xf32, #tpu.memory_space<vmem>>, vector<4x16xf32>
    %cst_10 = arith.constant dense<0.000000e+00> : vector<64x16xf32>
    %9 = tpu.matmul %7, %8, %cst_10 {dimension_numbers = #tpu.dot_dimension_numbers<[1], [0], [0], [1], [0, 0, 1, 1], [], []>} : vector<64x4xf32>, vector<4x16xf32>, vector<64x16xf32> -> vector<64x16xf32>
    %c0_11 = arith.constant 0 : index
    %c0_12 = arith.constant 0 : index
    %10 = vector.load %arg6[%c0_11, %c0_12] : memref<1x16xf32, #tpu.memory_space<vmem>>, vector<1x16xf32>
    %11 = vector.broadcast %10 : vector<1x16xf32> to vector<64x16xf32>
    %12 = arith.addf %9, %11 : vector<64x16xf32>
    %13 = vector.shape_cast %12 : vector<64x16xf32> to vector<8x8x16xf32>
    %14 = vector.shape_cast %6 : vector<8x16xf32> to vector<8x1x16xf32>
    %15 = vector.broadcast %14 : vector<8x1x16xf32> to vector<8x8x16xf32>
    %16 = arith.addf %13, %15 : vector<8x8x16xf32>
    %17 = math.tanh %16 : vector<8x8x16xf32>
    %c0_13 = arith.constant 0 : index
    %c0_14 = arith.constant 0 : index
    %18 = vector.load %arg7[%c0_13, %c0_14] : memref<1x16xf32, #tpu.memory_space<vmem>>, vector<1x16xf32>
    %19 = vector.shape_cast %18 : vector<1x16xf32> to vector<1x1x16xf32>
    %20 = vector.broadcast %19 : vector<1x1x16xf32> to vector<8x8x16xf32>
    %21 = arith.mulf %17, %20 : vector<8x8x16xf32>
    %cst_15 = arith.constant dense<0.000000e+00> : vector<8x8xf32>
    %22 = vector.multi_reduction <add>, %21, %cst_15 [2] : vector<8x8x16xf32> to vector<8x8xf32>
    %c0_16 = arith.constant 0 : index
    %23 = memref.load %arg8[%c0_16] : memref<1xf32, #tpu.memory_space<smem>>
    %24 = vector.broadcast %23 : f32 to vector<8x8xf32>
    %25 = arith.addf %22, %24 : vector<8x8xf32>
    %cst_17 = arith.constant dense<0xFF800000> : vector<8xf32>
    %26 = vector.multi_reduction <maximumf>, %25, %cst_17 [1] : vector<8x8xf32> to vector<8xf32>
    %27 = vector.shape_cast %26 : vector<8xf32> to vector<8x1xf32>
    %28 = vector.broadcast %27 : vector<8x1xf32> to vector<8x8xf32>
    %29 = arith.subf %25, %28 : vector<8x8xf32>
    %30 = math.exp %29 : vector<8x8xf32>
    %cst_18 = arith.constant dense<0.000000e+00> : vector<8xf32>
    %31 = vector.multi_reduction <add>, %30, %cst_18 [1] : vector<8x8xf32> to vector<8xf32>
    %32 = vector.shape_cast %31 : vector<8xf32> to vector<8x1xf32>
    %33 = tpu.reciprocal %32 {approx = true} : vector<8x1xf32> -> vector<8x1xf32>
    %34 = vector.broadcast %33 : vector<8x1xf32> to vector<8x8xf32>
    %35 = arith.mulf %30, %34 : vector<8x8xf32>
    %c0_19 = arith.constant 0 : index
    %c0_20 = arith.constant 0 : index
    %36 = vector.load %arg9[%c0_19, %c0_20] : memref<8x8xf32, #tpu.memory_space<vmem>>, vector<8x8xf32>
    tpu.vector_store %arg9[%c0_19, %c0_20], %35 {strides = array<i32>} : memref<8x8xf32, #tpu.memory_space<vmem>>, vector<8x8xf32>,
    %37 = vector.shape_cast %35 : vector<8x8xf32> to vector<8x1x8xf32>
    "tpu.trace_start"() <{level = 10 : i32, message = "bql,blf->bqf"}> : () -> ()
    %cst_21 = arith.constant dense<0.000000e+00> : vector<8x1x4xf32>
    %38 = tpu.matmul %37, %0, %cst_21 {dimension_numbers = #tpu.dot_dimension_numbers<[2], [1], [1], [2], [0, 0, 0, 1, 1, 2], [0], [0]>} : vector<8x1x8xf32>, vector<8x8x4xf32>, vector<8x1x4xf32> -> vector<8x1x4xf32>
    "tpu.trace_stop"() : () -> ()
    %39 = vector.shape_cast %38 : vector<8x1x4xf32> to vector<8x4xf32>
    %c0_22 = arith.constant 0 : index
    %c0_23 = arith.constant 0 : index
    %40 = vector.load %arg10[%c0_22, %c0_23] : memref<8x4xf32, #tpu.memory_space<vmem>>, vector<8x4xf32>
    tpu.vector_store %arg10[%c0_22, %c0_23], %39 {strides = array<i32>} : memref<8x4xf32, #tpu.memory_space<vmem>>, vector<8x4xf32>,
    return
  }
  func.func @transform_0(%arg0: i32) -> (i32, i32, i32) {
    %c0_i32 = arith.constant 0 : i32
    %c0_i32_0 = arith.constant 0 : i32
    %c0_i32_1 = arith.constant 0 : i32
    return %arg0, %c0_i32, %c0_i32_0 : i32, i32, i32
  }
  func.func @transform_1(%arg0: i32) -> (i32, i32) {
    %c0_i32 = arith.constant 0 : i32
    %c0_i32_0 = arith.constant 0 : i32
    return %arg0, %c0_i32 : i32, i32
  }
  func.func @transform_2(%arg0: i32) -> (i32, i32) {
    %c0_i32 = arith.constant 0 : i32
    %c0_i32_0 = arith.constant 0 : i32
    %c0_i32_1 = arith.constant 0 : i32
    return %c0_i32, %c0_i32_0 : i32, i32
  }
  func.func @transform_3(%arg0: i32) -> (i32, i32) {
    %c0_i32 = arith.constant 0 : i32
    %c0_i32_0 = arith.constant 0 : i32
    %c0_i32_1 = arith.constant 0 : i32
    return %c0_i32, %c0_i32_0 : i32, i32
  }
  func.func @transform_4(%arg0: i32) -> (i32, i32) {
    %c0_i32 = arith.constant 0 : i32
    %c0_i32_0 = arith.constant 0 : i32
    %c0_i32_1 = arith.constant 0 : i32
    return %c0_i32, %c0_i32_0 : i32, i32
  }
  func.func @transform_5(%arg0: i32) -> (i32, i32) {
    %c0_i32 = arith.constant 0 : i32
    %c0_i32_0 = arith.constant 0 : i32
    %c0_i32_1 = arith.constant 0 : i32
    return %c0_i32, %c0_i32_0 : i32, i32
  }
  func.func @transform_6(%arg0: i32) -> (i32, i32) {
    %c0_i32 = arith.constant 0 : i32
    %c0_i32_0 = arith.constant 0 : i32
    %c0_i32_1 = arith.constant 0 : i32
    return %c0_i32, %c0_i32_0 : i32, i32
  }
  func.func @transform_7(%arg0: i32) -> i32 {
    %c0_i32 = arith.constant 0 : i32
    %c0_i32_0 = arith.constant 0 : i32
    return %c0_i32 : i32
  }
  func.func @transform_8(%arg0: i32) -> (i32, i32) {
    %c0_i32 = arith.constant 0 : i32
    %c0_i32_0 = arith.constant 0 : i32
    return %arg0, %c0_i32 : i32, i32
  }
  func.func @transform_9(%arg0: i32) -> (i32, i32) {
    %c0_i32 = arith.constant 0 : i32
    %c0_i32_0 = arith.constant 0 : i32
    return %arg0, %c0_i32 : i32, i32
  }
}

</mosaic_0001>

<bundles_post_ra>
// kernel: tpu_custom_call.1
= control target key start
LH: loop header
LB: loop body
LE: loop exit
PB: predicated region body
PF: predicated region fallthrough
CT: control target
= control target key end

     0   :  { %vm104_vm0 = vcmask 1043456   ;;  %vm79_vm1 = vcmask 31744   ;;  %vm50_vm2 = vcmask 261120   ;;  %s957_s0 = inlined_call_operand.vmem [shape: f32[8,8,4], index: 0, kind: input, shape index: {}]   ;;  %s958_s1 = inlined_call_operand.vmem [shape: f32[8,32], index: 1, kind: input, shape index: {}]   ;;  %s959_s2 = inlined_call_operand.vmem [shape: f32[32,16], index: 2, kind: input, shape index: {}]   ;;  %s960_s3 = inlined_call_operand.vmem [shape: f32[1,16], index: 3, kind: input, shape index: {}]   ;;  %s961_s4 = inlined_call_operand.vmem [shape: f32[4,16], index: 4, kind: input, shape index: {}]   ;;  %s962_s5 = inlined_call_operand.vmem [shape: f32[1,16], index: 5, kind: input, shape index: {}]   ;;  %s963_s6 = inlined_call_operand.vmem [shape: f32[1,16], index: 6, kind: input, shape index: {}]   ;;  %s964_s7 = inlined_call_operand.<no memory space> [shape: f32[1], index: 7, kind: input, shape index: {}]   ;;  %s965_s8 = inlined_call_operand.hbm [shape: f32[8,8], index: 8, kind: output, shape index: {0}]   ;;  %s966_s9 = inlined_call_operand.vmem [shape: f32[8,4], index: 9, kind: output, shape index: {1}]  }
   0x1   :  { %v45_v0 = vld [vmem:[%s959_s2 + $0x18] sm:$0xff]  ;;  %v74_v1 = vld [vmem:[%s961_s4] sm:$0xf]  ;;  %v44_v3 = vld [vmem:[%s959_s2 + $0x10] sm:$0xff] }
   0x2   :  { %v33_v2 = vld [vmem:[%s957_s0] sm:$0xff]  ;;  %66 = vmatpush.msra.mxu0 %v45_v0  ;;  %661 = vmatpush.msk.msra.mxu1 %vm104_vm0, %v74_v1  ;;  %v43_v4 = vld [vmem:[%s959_s2 + $0x8] sm:$0xff]  ;;  %v821_v5 = vld [vmem:[%s957_s0 + $0x30] sm:$0xff] }
   0x3   :  { %662 = vmatmul.msk.f32.vlgmr.msra.gmra.mxu1 %vm79_vm1, %v33_v2  ;;  %679 = vmatpush.msk.msra.mxu3 %vm104_vm0, %v74_v1  ;;  %v34_v6 = vld [vmem:[%s957_s0 + $0x8] sm:$0xff]  ;;  %v42_v8 = vld [vmem:[%s959_s2] sm:$0xff]  ;;  %v36_v10 = vld [vmem:[%s957_s0 + $0x18] sm:$0xff] }
   0x4   :  { %67 = vmatpush.msra.mxu0 %v44_v3  ;;  %668 = vmatmul.msk.f32.vlgmr.msra.gmra.mxu3 %vm79_vm1, %v821_v5  ;;  %v831_v7 = vld [vmem:[%s957_s0 + $0x28] sm:$0xff]  ;;  %v41_v9 = vld [vmem:[%s958_s1] sm:$0xff]  ;;  %v35_v11 = vld [vmem:[%s957_s0 + $0x10] sm:$0xff] }
   0x5   :  { %678 = vmatpush.msk.msra.mxu2 %vm104_vm0, %v74_v1  ;;  %479 = vmatpush.msrb.mxu3 %v34_v6 }
   0x6   :  { %68 = vmatpush.msra.mxu0 %v43_v4  ;;  %667 = vmatmul.msk.f32.vlgmr.msra.gmra.mxu2 %vm79_vm1, %v831_v7 }
   0x7   :  { %457 = vmatpush.msrb.mxu2 %v33_v2  ;;  %523 = vmatpush.msra.mxu3 %v36_v10 }
   0x8   :  { %16 = vsyncpa [#allocation4], 0  ;;  %69 = vmatpush.msra.mxu0 %v42_v8  ;;  %v40_v12 = vld [vmem:[%s957_s0 + $0x38] sm:$0xff]  ;;  %v37_v13 = vld [vmem:[%s957_s0 + $0x20] sm:$0xff]  ;;  %vm201_vm3 = vcmask 130048   ;;  %vm254_vm4 = vcmask 1041409  }
   0x9   :  { %501 = vmatpush.msra.mxu2 %v35_v11  ;;  %660 = vmatmul.msk.f32.vlgmr.msra.gmra.mxu0 %vm50_vm2, %v41_v9  ;;  %v686_v15 = vld [vmem:[%s960_s3] ss:$0 sm:$0xff]  ;;  %vm256_vm5 = vcmask 1042434   ;;  %vm258_vm6 = vcmask 1043459   ;;  %vm260_vm7 = vcmask 1044484   ;;  %vm262_vm8 = vcmask 1045509  }
   0xa   :  { %545 = vmatpush.msrb.mxu0 %v37_v13  ;;  %v685_v16 = vld [vmem:[%s962_s5] ss:$0 sm:$0xff]  ;;  %vm264_vm9 = vcmask 1046534   ;;  %vm266_vm10 = vcmask 1047559   ;;  %vm269_vm11 = vcmask 64512   ;;  %s647_s18 = sshll.u32 %s965_s8, 4  ;;  %s648_s18 = int_to_ptr.hbm [resolvable:$true] %s647_s18 }
   0xb   :  { %663 = vmatmul.msk.f32.gmra.mxu1 %vm79_vm1, %v34_v6  ;;  %v687_v35 = vld [vmem:[%s963_s6] ss:$0 sm:$0xff]  ;;  %s749_s4 = smov [#allocation3]  }
   0xc   :  { %611 = vmatpush.msra.mxu0 %v40_v12  ;;  %669 = vmatmul.msk.f32.gmra.mxu3 %vm79_vm1, %v40_v12  ;;  %s645_s19 = sshll.u32 %s749_s4, 4  ;;  %s646_s19 = int_to_ptr.vmem [resolvable:$true] %s645_s19 }
  0x13   :  { %664 = vmatmul.msk.f32.gmra.mxu1 %vm79_vm1, %v35_v11 }
  0x1b   :  { %665 = vmatmul.msk.f32.gmra.mxu1 %vm79_vm1, %v36_v10 }
  0x23   :  { %666 = vmatmul.msk.f32.gmra.mxu1 %vm79_vm1, %v37_v13 }
  0x80   :  { %v125_v14 = vpop.f32.mrf.mxu1 }
  0x81   :  { %v126_v21 = vadd.f32 %v685_v16, %v125_v14 }
  0x86   :  { %v71_v17 = vpop.f32.mrf.mxu0 }
  0x87   :  { %v72_v18 = vadd.f32 %v686_v15, %v71_v17  ;;  %v143_v26 = vpop.f32.mrf.mxu3 }
  0x88   :  { %v128_v19 = vpop.f32.mrf.mxu1  ;;  %v144_v32 = vadd.f32 %v685_v16, %v143_v26 }
  0x89   :  { %v150_v20 = vrot.slane %v72_v18, 1  ;;  %v157_v22 = vperm.slane %v72_v18, 0  ;;  %v151_v24 = vrot.slane %v72_v18, 2  ;;  %v129_v25 = vadd.f32 %v685_v16, %v128_v19  ;;  %v140_v55 = vpop.f32.mrf.mxu2 }
  0x8a   :  { %v155_v27 = vrot.slane %v72_v18, 6  ;;  %v152_v37 = vrot.slane %v72_v18, 3  ;;  %v156_v41 = vrot.slane %v72_v18, 7  ;;  %v154_v53 = vrot.slane %v72_v18, 5 }
  0x8b   :  { %v158_v23 = vperm.slane %v150_v20, 0  ;;  %v173_v28 = vadd.f32 %v157_v22, %v126_v21  ;;  %v159_v30 = vperm.slane %v151_v24, 0  ;;  %v153_v57 = vrot.slane %v72_v18, 4 }
  0x8c   :  { %v163_v33 = vperm.slane %v155_v27, 0  ;;  %v160_v44 = vperm.slane %v152_v37, 0  ;;  %v164_v49 = vperm.slane %v156_v41, 0  ;;  %v141_v61 = vadd.f32 %v685_v16, %v140_v55 }
  0x8d   :  { %v174_v29 = vadd.f32 %v158_v23, %v129_v25  ;;  %688 = vtanh.f32 %v173_v28  ;;  %v162_v62 = vperm.slane %v154_v53, 0  ;;  %v161_v1 = vperm.slane %v153_v57, 0 }
  0x8e   :  { %v179_v39 = vadd.f32 %v163_v33, %v144_v32  ;;  %v244_v24 = vlaneseq  ;;  %v227_v25 = vstv %s964_s7  ;;  %v748_v55 = vmov 0  }
  0x8f   :  { %690 = vtanh.f32 %v174_v29  ;;  %v146_v42 = vpop.f32.mrf.mxu3  ;;  %v178_v8 = vadd.f32 %v162_v62, %v141_v61  ;;  %684 = vset.pattern.permute.xlu2 %v748_v55  ;;  %683 = vset.pattern.permute.xlu1 %v748_v55 }
  0x90   :  { %v131_v31 = vpop.f32.mrf.mxu1  ;;  %v147_v48 = vadd.f32 %v685_v16, %v146_v42  ;;  %v879_v28 = vand.u32 127, %v244_v24  ;;  %682 = vset.pattern.permute.xlu0 %v748_v55 }
  0x91   :  { %v132_v34 = vadd.f32 %v685_v16, %v131_v31 }
  0x92   :  { %v180_v56 = vadd.f32 %v164_v49, %v147_v48 }
  0x93   :  { %v175_v36 = vadd.f32 %v159_v30, %v132_v34  ;;  %v689_v38 = vpop.eup %688 }
  0x94   :  { %v193_v40 = vmul.f32 %v689_v38, %v687_v35 }
  0x95   :  { %692 = vtanh.f32 %v175_v36  ;;  %v691_v45 = vpop.eup %690 }
  0x96   :  { %v202_v43 = vsel %vm201_vm3, %v193_v40, 0.0  ;;  %694 = vtanh.f32 %v179_v39  ;;  %v194_v52 = vmul.f32 %v691_v45, %v687_v35 }
  0x97   :  { %203 = vadd.xlane.f32.xlu0 %v202_v43 }
  0x98   :  { %v134_v46 = vpop.f32.mrf.mxu1  ;;  %v205_v60 = vsel %vm201_vm3, %v194_v52, 0.0 }
  0x99   :  { %v135_v47 = vadd.f32 %v685_v16, %v134_v46 }
  0x9b   :  { %v693_v50 = vpop.eup %692  ;;  %v176_v51 = vadd.f32 %v160_v44, %v135_v47 }
  0x9c   :  { %v195_v54 = vmul.f32 %v693_v50, %v687_v35  ;;  %v695_v58 = vpop.eup %694 }
  0x9d   :  { %696 = vtanh.f32 %v176_v51  ;;  %v199_v2 = vmul.f32 %v695_v58, %v687_v35 }
  0x9e   :  { %v208_v59 = vsel %vm201_vm3, %v195_v54, 0.0  ;;  %698 = vtanh.f32 %v180_v56 }
  0x9f   :  { %209 = vadd.xlane.f32.xlu1 %v208_v59  ;;  %206 = vadd.xlane.f32.xlu0 %v205_v60  ;;  %v220_v9 = vsel %vm201_vm3, %v199_v2, 0.0 }
  0xa0   :  { %v137_v63 = vpop.f32.mrf.mxu1 }
  0xa1   :  { %v138_v0 = vadd.f32 %v685_v16, %v137_v63 }
  0xa3   :  { %v697_v3 = vpop.eup %696  ;;  %v177_v4 = vadd.f32 %v161_v1, %v138_v0 }
  0xa4   :  { %v196_v6 = vmul.f32 %v697_v3, %v687_v35  ;;  %v699_v11 = vpop.eup %698 }
  0xa5   :  { %700 = vtanh.f32 %v177_v4  ;;  %v200_v12 = vmul.f32 %v699_v11, %v687_v35 }
  0xa6   :  { %v211_v10 = vsel %vm201_vm3, %v196_v6, 0.0  ;;  %702 = vtanh.f32 %v178_v8 }
  0xa7   :  { %212 = vadd.xlane.f32.xlu1 %v211_v10  ;;  %221 = vadd.xlane.f32.xlu0 %v220_v9  ;;  %v223_v16 = vsel %vm201_vm3, %v200_v12, 0.0 }
  0xab   :  { %v701_v13 = vpop.eup %700 }
  0xac   :  { %v197_v14 = vmul.f32 %v701_v13, %v687_v35  ;;  %v703_v17 = vpop.eup %702 }
  0xad   :  { %v198_v18 = vmul.f32 %v703_v17, %v687_v35 }
  0xae   :  { %v214_v15 = vsel %vm201_vm3, %v197_v14, 0.0 }
  0xaf   :  { %215 = vadd.xlane.f32.xlu2 %v214_v15  ;;  %224 = vadd.xlane.f32.xlu1 %v223_v16  ;;  %v217_v19 = vsel %vm201_vm3, %v198_v18, 0.0 }
  0xb7   :  { %218 = vadd.xlane.f32.xlu2 %v217_v19 }
 0x10a   :  { %v204_v20 = vpop.xlane.xlu0 %203 }
 0x10b   :  { %v228_v29 = vadd.f32 %v227_v25, %v204_v20 }
 0x10d   :  { %v246_v34 = vperm.slane %v228_v29, %v879_v28 }
 0x112   :  { %v210_v21 = vpop.xlane.xlu1 %209  ;;  %v207_v22 = vpop.xlane.xlu0 %206 }
 0x113   :  { %v229_v26 = vadd.f32 %v227_v25, %v207_v22  ;;  %v230_v30 = vadd.f32 %v227_v25, %v210_v21 }
 0x115   :  { %v247_v31 = vperm.slane %v229_v26, %v879_v28  ;;  %v248_v36 = vperm.slane %v230_v30, %v879_v28 }
 0x117   :  { %v255_v38 = vsel %vm254_vm4, %v247_v31, %v246_v34 }
 0x118   :  { %v257_v45 = vsel %vm256_vm5, %v248_v36, %v255_v38 }
 0x11a   :  { %v213_v23 = vpop.xlane.xlu1 %212  ;;  %v222_v35 = vpop.xlane.xlu0 %221 }
 0x11b   :  { %v231_v32 = vadd.f32 %v227_v25, %v213_v23  ;;  %v234_v40 = vadd.f32 %v227_v25, %v222_v35 }
 0x11d   :  { %v249_v39 = vperm.slane %v231_v32, %v879_v28  ;;  %v252_v48 = vperm.slane %v234_v40, %v879_v28 }
 0x11f   :  { %v259_v46 = vsel %vm258_vm6, %v249_v39, %v257_v45 }
 0x122   :  { %v216_v27 = vpop.xlane.xlu2 %215  ;;  %v225_v37 = vpop.xlane.xlu1 %224 }
 0x123   :  { %v232_v33 = vadd.f32 %v227_v25, %v216_v27  ;;  %v235_v43 = vadd.f32 %v227_v25, %v225_v37 }
 0x125   :  { %v250_v41 = vperm.slane %v232_v33, %v879_v28  ;;  %v253_v50 = vperm.slane %v235_v43, %v879_v28 }
 0x127   :  { %v261_v49 = vsel %vm260_vm7, %v250_v41, %v259_v46 }
 0x12a   :  { %v219_v42 = vpop.xlane.xlu2 %218 }
 0x12b   :  { %v233_v44 = vadd.f32 %v227_v25, %v219_v42 }
 0x12d   :  { %v251_v47 = vperm.slane %v233_v44, %v879_v28 }
 0x12f   :  { %v263_v51 = vsel %vm262_vm8, %v251_v47, %v261_v49 }
 0x130   :  { %v265_v52 = vsel %vm264_vm9, %v252_v48, %v263_v51 }
 0x131   :  { %v267_v53 = vsel %vm266_vm10, %v253_v50, %v265_v52 }
 0x132   :  { %v270_v54 = vsel %vm269_vm11, %v267_v53, -inf }
 0x133   :  { %271 = vmax.xlane.f32.xlu2 %v270_v54 }
 0x1a6   :  { %v272_v56 = vpop.xlane.xlu2 %271 }
 0x1a7   :  { %v276_v57 = vperm.slane %v272_v56, 2  ;;  %v275_v58 = vperm.slane %v272_v56, 1  ;;  %v274_v59 = vperm.slane %v272_v56, 0  ;;  %v277_v63 = vperm.slane %v272_v56, 3 }
 0x1a8   :  { %v278_v0 = vperm.slane %v272_v56, 4  ;;  %v281_v1 = vperm.slane %v272_v56, 7  ;;  %v279_v11 = vperm.slane %v272_v56, 5  ;;  %v280_v13 = vperm.slane %v272_v56, 6 }
 0x1a9   :  { %v292_v60 = vsub.f32 %v230_v30, %v276_v57  ;;  %v291_v61 = vsub.f32 %v229_v26, %v275_v58  ;;  %v290_v62 = vsub.f32 %v228_v29, %v274_v59  ;;  %v293_v6 = vsub.f32 %v231_v32, %v277_v63 }
 0x1aa   :  { %v294_v8 = vsub.f32 %v232_v33, %v278_v0  ;;  %v297_v9 = vsub.f32 %v235_v43, %v281_v1  ;;  %v295_v18 = vsub.f32 %v233_v44, %v279_v11  ;;  %v296_v19 = vsub.f32 %v234_v40, %v280_v13 }
 0x1ab   :  { %v302_v2 = vmul.f32 1.442695, %v292_v60  ;;  %v300_v3 = vmul.f32 1.442695, %v291_v61  ;;  %v298_v4 = vmul.f32 1.442695, %v290_v62 }
 0x1ac   :  { %v304_v10 = vmul.f32 1.442695, %v293_v6  ;;  %v306_v12 = vmul.f32 1.442695, %v294_v8  ;;  %v312_v15 = vmul.f32 1.442695, %v297_v9 }
 0x1ad   :  { %704 = vpow2.f32 %v302_v2  ;;  %v308_v20 = vmul.f32 1.442695, %v295_v18  ;;  %v310_v21 = vmul.f32 1.442695, %v296_v19 }
 0x1ae   :  { %706 = vpow2.f32 %v300_v3 }
 0x1af   :  { %708 = vpow2.f32 %v298_v4 }
 0x1b0   :  { %710 = vpow2.f32 %v304_v10 }
 0x1b1   :  { %712 = vpow2.f32 %v306_v12 }
 0x1b2   :  { %714 = vpow2.f32 %v312_v15 }
 0x1b3   :  { %v897_v14 = vpop.eup %704  ;;  %716 = vpow2.f32 %v308_v20 }
 0x1b4   :  { %v707_v16 = vpop.eup %706  ;;  %329 = vperm.xlu2 %684, %v897_v14   ;;  %718 = vpow2.f32 %v310_v21 }
 0x1b5   :  { %v709_v17 = vpop.eup %708  ;;  %326 = vperm.xlu1 %683, %v707_v16  }
 0x1b6   :  { %323 = vperm.xlu0 %682, %v709_v17   ;;  %v711_v22 = vpop.eup %710 }
 0x1b7   :  { %v713_v23 = vpop.eup %712 }
 0x1b8   :  { %v715_v24 = vpop.eup %714 }
 0x1b9   :  { %v717_v25 = vpop.eup %716 }
 0x1ba   :  { %v719_v26 = vpop.eup %718 }
 0x1bc   :  { %332 = vperm.xlu2 %684, %v711_v22  }
 0x1bd   :  { %335 = vperm.xlu1 %683, %v713_v23  }
 0x1be   :  { %344 = vperm.xlu0 %682, %v715_v24  }
 0x1c4   :  { %338 = vperm.xlu2 %684, %v717_v25  }
 0x1c5   :  { %341 = vperm.xlu1 %683, %v719_v26  }
 0x20e   :  { %v330_v27 = vpop.permute.xlu2 %329 }
 0x20f   :  { %v348_v36 = vperm.slane %v330_v27, %v879_v28 }
 0x216   :  { %v333_v31 = vpop.permute.xlu2 %332 }
 0x217   :  { %v349_v39 = vperm.slane %v333_v31, %v879_v28 }
 0x21e   :  { %v339_v40 = vpop.permute.xlu2 %338 }
 0x21f   :  { %v351_v44 = vperm.slane %v339_v40, %v879_v28 }
 0x227   :  { %v327_v29 = vpop.permute.xlu1 %326 }
 0x228   :  { %v324_v30 = vpop.permute.xlu0 %323  ;;  %v347_v32 = vperm.slane %v327_v29, %v879_v28 }
 0x229   :  { %v346_v33 = vperm.slane %v324_v30, %v879_v28 }
 0x22b   :  { %v354_v34 = vsel %vm254_vm4, %v347_v32, %v346_v33 }
 0x22c   :  { %v355_v37 = vsel %vm256_vm5, %v348_v36, %v354_v34 }
 0x22d   :  { %v356_v41 = vsel %vm258_vm6, %v349_v39, %v355_v37 }
 0x22f   :  { %v336_v35 = vpop.permute.xlu1 %335 }
 0x230   :  { %v350_v38 = vperm.slane %v336_v35, %v879_v28  ;;  %v345_v43 = vpop.permute.xlu0 %344 }
 0x231   :  { %v353_v47 = vperm.slane %v345_v43, %v879_v28 }
 0x232   :  { %v357_v42 = vsel %vm260_vm7, %v350_v38, %v356_v41 }
 0x233   :  { %v358_v48 = vsel %vm262_vm8, %v351_v44, %v357_v42 }
 0x237   :  { %v342_v45 = vpop.permute.xlu1 %341 }
 0x238   :  { %v352_v46 = vperm.slane %v342_v45, %v879_v28 }
 0x23a   :  { %v359_v49 = vsel %vm264_vm9, %v352_v46, %v358_v48 }
 0x23b   :  { %v360_v50 = vsel %vm266_vm10, %v353_v47, %v359_v49 }
 0x23c   :  { %v362_v51 = vsel %vm269_vm11, %v360_v50, 0.0 }
 0x23d   :  { %363 = vadd.xlane.f32.xlu2 %v362_v51 }
 0x2b0   :  { %v364_v52 = vpop.xlane.xlu2 %363 }
 0x2b1   :  { %720 = vrcp.f32 %v364_v52 }
 0x2b7   :  { %v721_v53 = vpop.eup %720 }
 0x2b8   :  { %v368_v54 = vperm.slane %v721_v53, 1  ;;  %v367_v55 = vperm.slane %v721_v53, 0  ;;  %v370_v58 = vperm.slane %v721_v53, 3  ;;  %v369_v59 = vperm.slane %v721_v53, 2 }
 0x2b9   :  { %v372_v62 = vperm.slane %v721_v53, 5  ;;  %v371_v63 = vperm.slane %v721_v53, 4  ;;  %v374_v2 = vperm.slane %v721_v53, 7  ;;  %v373_v3 = vperm.slane %v721_v53, 6 }
 0x2ba   :  { %v384_v56 = vmul.f32 %v707_v16, %v368_v54  ;;  %v383_v57 = vmul.f32 %v709_v17, %v367_v55  ;;  %v386_v60 = vmul.f32 %v711_v22, %v370_v58  ;;  %v385_v61 = vmul.f32 %v897_v14, %v369_v59 }
 0x2bb   :  { %v388_v0 = vmul.f32 %v717_v25, %v372_v62  ;;  %v387_v1 = vmul.f32 %v713_v23, %v371_v63  ;;  %v390_v4 = vmul.f32 %v715_v24, %v374_v2  ;;  %v389_v6 = vmul.f32 %v719_v26, %v373_v3 }
 0x2bc   :  { %403 = vperm.xlu0 %682, %v384_v56   ;;  %400 = vperm.xlu1 %683, %v383_v57  }
 0x2c4   :  { %409 = vperm.xlu0 %682, %v386_v60   ;;  %406 = vperm.xlu1 %683, %v385_v61  }
 0x2cc   :  { %415 = vperm.xlu0 %682, %v388_v0   ;;  %412 = vperm.xlu1 %683, %v387_v1  }
 0x2d4   :  { %421 = vperm.xlu0 %682, %v390_v4   ;;  %418 = vperm.xlu1 %683, %v389_v6  }
 0x32e   :  { %v404_v8 = vpop.permute.xlu0 %403  ;;  %v401_v9 = vpop.permute.xlu1 %400 }
 0x32f   :  { %v424_v10 = vperm.slane %v404_v8, %v879_v28  ;;  %v423_v11 = vperm.slane %v401_v9, %v879_v28 }
 0x331   :  { %670 = vmatmul.msk.f32.vlgmr.msrb.gmra.mxu2 %vm269_vm11, %v423_v11  ;;  %671 = vmatmul.msk.f32.vlgmr.msrb.gmra.mxu3 %vm269_vm11, %v424_v10 }
 0x332   :  { %567 = vmatpush.msrb.mxu2 %v831_v7  ;;  %589 = vmatpush.msrb.mxu3 %v821_v5  ;;  %v431_v7 = vsel %vm254_vm4, %v424_v10, %v423_v11 }
 0x336   :  { %v410_v12 = vpop.permute.xlu0 %409  ;;  %v407_v13 = vpop.permute.xlu1 %406 }
 0x337   :  { %v426_v14 = vperm.slane %v410_v12, %v879_v28  ;;  %v425_v15 = vperm.slane %v407_v13, %v879_v28 }
 0x339   :  { %672 = vmatmul.msk.f32.vlgmr.msra.gmra.mxu2 %vm269_vm11, %v425_v15  ;;  %673 = vmatmul.msk.f32.vlgmr.msra.gmra.mxu3 %vm269_vm11, %v426_v14  ;;  %v432_v5 = vsel %vm256_vm5, %v425_v15, %v431_v7 }
 0x33a   :  { %v433_v20 = vsel %vm258_vm6, %v426_v14, %v432_v5 }
 0x33e   :  { %v416_v16 = vpop.permute.xlu0 %415  ;;  %v413_v17 = vpop.permute.xlu1 %412 }
 0x33f   :  { %v428_v18 = vperm.slane %v416_v16, %v879_v28  ;;  %v427_v19 = vperm.slane %v413_v17, %v879_v28 }
 0x341   :  { %674 = vmatmul.msk.f32.vlgmr.msrb.gmra.mxu0 %vm269_vm11, %v427_v19  ;;  %675 = vmatmul.msk.f32.vlgmr.msrb.gmra.mxu2 %vm269_vm11, %v428_v18  ;;  %v434_v21 = vsel %vm260_vm7, %v427_v19, %v433_v20 }
 0x342   :  { %v435_v26 = vsel %vm262_vm8, %v428_v18, %v434_v21 }
 0x346   :  { %v422_v22 = vpop.permute.xlu0 %421  ;;  %v419_v23 = vpop.permute.xlu1 %418 }
 0x347   :  { %v430_v24 = vperm.slane %v422_v22, %v879_v28  ;;  %v429_v25 = vperm.slane %v419_v23, %v879_v28 }
 0x349   :  { %v436_v27 = vsel %vm264_vm9, %v429_v25, %v435_v26  ;;  %676 = vmatmul.msk.f32.vlgmr.msrb.gmra.mxu3 %vm269_vm11, %v429_v25  ;;  %677 = vmatmul.msk.f32.vlgmr.msra.gmra.mxu0 %vm269_vm11, %v430_v24 }
 0x34a   :  { %v437_v29 = vsel %vm266_vm10, %v430_v24, %v436_v27 }
 0x34b   :  { %439 = vst.msk [vmem:[#allocation3] sm:$0xff] %vm269_vm11, %v437_v29 }
 0x34c   :  { %650 = dma.vmem_to_hbm [thread:$0]  %s646_s19, 128, %s648_s18, [#allocation4]  }
 0x3b4   :  { %v459_v28 = vpop.f32.mrf.mxu2  ;;  %v481_v30 = vpop.f32.mrf.mxu3 }
 0x3b5   :  { %v624_v33 = vrot.slane %v481_v30, 7 }
 0x3b7   :  { %v625_v36 = vsel %vm254_vm4, %v624_v33, %v459_v28 }
 0x3bc   :  { %v503_v31 = vpop.f32.mrf.mxu2  ;;  %v525_v35 = vpop.f32.mrf.mxu3 }
 0x3bd   :  { %v626_v34 = vrot.slane %v503_v31, 6  ;;  %v628_v37 = vrot.slane %v525_v35, 5 }
 0x3be   :  { %v547_v32 = vpop.f32.mrf.mxu0 }
 0x3bf   :  { %v627_v38 = vsel %vm256_vm5, %v626_v34, %v625_v36  ;;  %v630_v40 = vrot.slane %v547_v32, 4 }
 0x3c0   :  { %v629_v41 = vsel %vm258_vm6, %v628_v37, %v627_v38 }
 0x3c1   :  { %v631_v45 = vsel %vm260_vm7, %v630_v40, %v629_v41 }
 0x3c4   :  { %v569_v39 = vpop.f32.mrf.mxu2 }
 0x3c5   :  { %v632_v42 = vrot.slane %v569_v39, 3 }
 0x3c6   :  { %v613_v43 = vpop.f32.mrf.mxu0 }
 0x3c7   :  { %v633_v47 = vsel %vm262_vm8, %v632_v42, %v631_v45  ;;  %v636_v48 = vrot.slane %v613_v43, 1 }
 0x3cc   :  { %v591_v44 = vpop.f32.mrf.mxu3 }
 0x3cd   :  { %v634_v46 = vrot.slane %v591_v44, 2 }
 0x3cf   :  { %v635_v49 = vsel %vm264_vm9, %v634_v46, %v633_v47 }
 0x3d0   :  { %v637_v50 = vsel %vm266_vm10, %v636_v48, %v635_v49 }
 0x3d1   :  { %639 = vst.msk [vmem:[%s966_s9] sm:$0xff] %vm79_vm1, %v637_v50 }
 0x3d2   :  { %746 = dma.done.wait [#allocation4], 128  }
 0x3d3   :  { %747 = vsyncadd [#allocation4], 4294967168 }
 0x3d4   :  { %659 = vsyncpa [#allocation4], 1 }

</bundles_post_ra>
